<compile_context>
chip_gen: v7x
topology: tpu7x:2x2x1
jax: 0.10.0
libtpu: 0.0.40
codegen_flags: <defaults>
</compile_context>

<pallas_src>
import math
from functools import partial

import jax
import jax.numpy as jnp
from jax.experimental import pallas as pl
from jax.experimental.pallas import tpu as pltpu

NUM_HEADS = 4


def _temporal_pool_kernel(x_ref, wvs_ref, bvs_ref, sp_ref, vp_ref, e_ref,
                          wo_ref, bo_ref, out_ref, *, b_tile, n, num_heads):
    d = vp_ref.shape[-1]
    x = x_ref[...]                                            # (b_tile*n, d)

    # Fused V-projection + per-head (pre-scaled) score projection: one matmul.
    vs = jnp.dot(x, wvs_ref[...],
                 preferred_element_type=jnp.float32) + bvs_ref[...]
    v = vs[:, :d]                                             # (rows, d)
    s = vs[:, d:]                                             # (rows, H)

    # Online softmax over the n token keys + the (constant) pool key.
    s3 = s.reshape(b_tile, n, num_heads)                      # (b_tile, n, H)
    s_pool = sp_ref[...]                                      # (1, H)
    m = jnp.maximum(jnp.max(s3, axis=1, keepdims=True),
                    s_pool[None, :, :])                       # (b_tile, 1, H)
    p_tok = jnp.exp(s3 - m)                                   # (b_tile, n, H)
    p_pool = jnp.exp(s_pool[None, :, :] - m)                  # (b_tile, 1, H)
    denom = jnp.sum(p_tok, axis=1, keepdims=True) + p_pool    # (b_tile, 1, H)
    inv = 1.0 / denom
    pn = (p_tok * inv).reshape(b_tile * n, num_heads)         # normalized probs
    pp = (p_pool * inv).reshape(b_tile, num_heads)

    # Expand per-head probs to per-channel (E[h, c] = 1 if c in head h).
    e = e_ref[...]                                            # (H, d)
    pfull = jnp.dot(pn, e, preferred_element_type=jnp.float32)   # (rows, d)
    out_tok = jnp.sum((pfull * v).reshape(b_tile, n, d), axis=1)  # (b_tile, d)
    ppfull = jnp.dot(pp, e, preferred_element_type=jnp.float32)   # (b_tile, d)
    attn = out_tok + ppfull * vp_ref[...]                         # (b_tile, d)

    out = jnp.dot(attn, wo_ref[...],
                  preferred_element_type=jnp.float32) + bo_ref[...]
    out_ref[...] = out.astype(out_ref.dtype)                  # lane-dense (b_tile, d)


def temporal_pooling(x, params, *, b_tile=None):
    """x: (b, f, n, d) float32 -> (b, f, d) float32."""
    b, f, n, d = x.shape
    B = b * f
    H = NUM_HEADS
    assert d % H == 0, "embed dim must be divisible by num_heads"
    hd = d // H
    scale = 1.0 / math.sqrt(hd)

    # ---- hoisted pool-token constants (tiny XLA work, done once) ----
    pool = params["pool_token"].reshape(1, d)
    q = pool @ params["wq"] + params["bq"]                    # (1, d)
    k_pool = pool @ params["wk"] + params["bk"]               # (1, d)
    v_pool = pool @ params["wv"] + params["bv"]               # (1, d)

    head_of = jnp.arange(d) // hd
    mask = (head_of[:, None] == jnp.arange(H)[None, :]).astype(jnp.float32)  # (d, H)
    q_heads = q.reshape(d, 1) * scale * mask                  # (d, H) masked, scaled query
    s_pool = k_pool @ q_heads                                 # (1, H) pool-key scores
    e_mat = mask.T                                            # (H, d) head->channel expansion

    # Fold K-projection into the score map, fuse with V-projection.
    w_s = params["wk"] @ q_heads                              # (d, H)
    b_s = params["bk"] @ q_heads                              # (1, H)
    w_vs = jnp.concatenate([params["wv"], w_s], axis=1)       # (d, d+H)
    b_vs = jnp.concatenate([params["bv"], b_s], axis=1)       # (1, d+H)

    # ---- tile selection: batch many sequences per grid step ----
    if b_tile is None:
        b_tile = max(1, 512 // max(n, 1))
    b_tile = ((b_tile + 7) // 8) * 8                          # sublane-aligned
    b_tile = min(b_tile, ((B + 7) // 8) * 8)
    B_pad = ((B + b_tile - 1) // b_tile) * b_tile

    xr = x.reshape(B, n, d)
    if B_pad != B:
        xr = jnp.concatenate(
            [xr, jnp.zeros((B_pad - B, n, d), x.dtype)], axis=0)
    x2 = xr.reshape(B_pad * n, d)                             # flat token slab

    rows = b_tile * n
    grid = (B_pad // b_tile,)

    out = pl.pallas_call(
        partial(_temporal_pool_kernel, b_tile=b_tile, n=n, num_heads=H),
        out_shape=jax.ShapeDtypeStruct((B_pad, d), jnp.float32),
        grid_spec=pltpu.PrefetchScalarGridSpec(
            num_scalar_prefetch=0,
            grid=grid,
            in_specs=[
                pl.BlockSpec((rows, d), lambda i: (i, 0)),        # x tokens
                pl.BlockSpec((d, d + H), lambda i: (0, 0)),       # fused Wv || Ws
                pl.BlockSpec((1, d + H), lambda i: (0, 0)),       # fused bv || bs
                pl.BlockSpec((1, H), lambda i: (0, 0)),           # pool-key scores
                pl.BlockSpec((1, d), lambda i: (0, 0)),           # pool value row
                pl.BlockSpec((H, d), lambda i: (0, 0)),           # head expansion E
                pl.BlockSpec((d, d), lambda i: (0, 0)),           # Wo^T
                pl.BlockSpec((1, d), lambda i: (0, 0)),           # bo
            ],
            out_specs=pl.BlockSpec((b_tile, d), lambda i: (i, 0)),
        ),
        compiler_params=pltpu.CompilerParams(dimension_semantics=("parallel",)),
    )(x2, w_vs, b_vs, s_pool, v_pool, e_mat, params["wo"], params["bo"])
    return out[:B].reshape(b, f, d)


def reference_jax(x, params):
    """Pure-JAX reference matching nn.MultiheadAttention(batch_first=True)."""
    b, f, n, d = x.shape
    pt = jnp.broadcast_to(params["pool_token"].reshape(1, 1, 1, d), (b, f, 1, d))
    xp = jnp.concatenate([pt, x], axis=2).reshape(b * f, n + 1, d)
    q = xp[:, :1] @ params["wq"] + params["bq"]
    k = xp @ params["wk"] + params["bk"]
    v = xp @ params["wv"] + params["bv"]
    B, N1, D = xp.shape
    hd = D // NUM_HEADS
    qh = q.reshape(B, 1, NUM_HEADS, hd).transpose(0, 2, 1, 3)
    kh = k.reshape(B, N1, NUM_HEADS, hd).transpose(0, 2, 1, 3)
    vh = v.reshape(B, N1, NUM_HEADS, hd).transpose(0, 2, 1, 3)
    s = jnp.einsum('bhqc,bhkc->bhqk', qh, kh) / jnp.sqrt(jnp.float32(hd))
    p = jax.nn.softmax(s, axis=-1)
    o = jnp.einsum('bhqk,bhkc->bhqc', p, vh).transpose(0, 2, 1, 3).reshape(B, 1, D)
    out = o @ params["wo"] + params["bo"]
    return out.reshape(b, f, d)


def init_params(key, d):
    """Deterministic synthetic params mirroring the module's __init__ shapes."""
    keys = jax.random.split(key, 6)
    pool_token = jax.random.normal(keys[0], (1, 1, d), jnp.float32)
    in_proj_w = jax.random.normal(keys[1], (3 * d, d), jnp.float32) * 0.1
    in_proj_b = jax.random.normal(keys[2], (3 * d,), jnp.float32) * 0.1
    out_w = jax.random.normal(keys[3], (d, d), jnp.float32) * 0.1
    out_b = jax.random.normal(keys[4], (d,), jnp.float32) * 0.1
    return {
        "pool_token": pool_token,
        "wq": in_proj_w[0 * d:1 * d].T, "bq": in_proj_b[0 * d:1 * d].reshape(1, d),
        "wk": in_proj_w[1 * d:2 * d].T, "bk": in_proj_b[1 * d:2 * d].reshape(1, d),
        "wv": in_proj_w[2 * d:3 * d].T, "bv": in_proj_b[2 * d:3 * d].reshape(1, d),
        "wo": out_w.T, "bo": out_b.reshape(1, d),
    }


if __name__ == "__main__":
    key = jax.random.PRNGKey(0)
    k_x, k_p = jax.random.split(key)

    b, f, n, d = 2, 4, 16, 32          # small shapes: batch, frames, tokens, dim
    x = jax.random.normal(k_x, (b, f, n, d), jnp.float32)
    params = init_params(k_p, d)

    out = temporal_pooling(x, params)
    out = jax.block_until_ready(out)

    ref = jax.block_until_ready(reference_jax(x, params))
    assert out.shape == (b, f, d)
    assert jnp.allclose(out, ref, atol=1e-4, rtol=1e-4), "mismatch vs JAX reference"

    print("KERNEL_OK")
</pallas_src>

<mosaic_0001>
module attributes {stable_mosaic.version = 11 : i64} {
  func.func @_temporal_pool_kernel(%arg0: i32, %arg1: memref<128x32xf32, #tpu.memory_space<vmem>>, %arg2: memref<32x36xf32, #tpu.memory_space<vmem>>, %arg3: memref<1x36xf32, #tpu.memory_space<vmem>>, %arg4: memref<1x4xf32, #tpu.memory_space<vmem>>, %arg5: memref<1x32xf32, #tpu.memory_space<vmem>>, %arg6: memref<4x32xf32, #tpu.memory_space<vmem>>, %arg7: memref<32x32xf32, #tpu.memory_space<vmem>>, %arg8: memref<1x32xf32, #tpu.memory_space<vmem>>, %arg9: memref<8x32xf32, #tpu.memory_space<vmem>>) attributes {dimension_semantics = [#tpu.dimension_semantics<parallel>], iteration_bounds = array<i64: 1>, scalar_prefetch = 0 : i64, scratch_operands = 0 : i64, tpu.core_type = #tpu.core_type<tc>, window_params = [{transform_indices = @transform_0, window_bounds = array<i64: 128, 32>}, {pipeline_mode = #tpu.pipeline_mode<synchronous>, transform_indices = @transform_1, window_bounds = array<i64: 32, 36>}, {pipeline_mode = #tpu.pipeline_mode<synchronous>, transform_indices = @transform_2, window_bounds = array<i64: 1, 36>}, {pipeline_mode = #tpu.pipeline_mode<synchronous>, transform_indices = @transform_3, window_bounds = array<i64: 1, 4>}, {pipeline_mode = #tpu.pipeline_mode<synchronous>, transform_indices = @transform_4, window_bounds = array<i64: 1, 32>}, {pipeline_mode = #tpu.pipeline_mode<synchronous>, transform_indices = @transform_5, window_bounds = array<i64: 4, 32>}, {pipeline_mode = #tpu.pipeline_mode<synchronous>, transform_indices = @transform_6, window_bounds = array<i64: 32, 32>}, {pipeline_mode = #tpu.pipeline_mode<synchronous>, transform_indices = @transform_7, window_bounds = array<i64: 1, 32>}, {transform_indices = @transform_8, window_bounds = array<i64: 8, 32>}]} {
    %c0 = arith.constant 0 : index
    %c0_0 = arith.constant 0 : index
    %0 = vector.load %arg1[%c0, %c0_0] : memref<128x32xf32, #tpu.memory_space<vmem>>, vector<128x32xf32>
    %c0_1 = arith.constant 0 : index
    %c0_2 = arith.constant 0 : index
    %1 = vector.load %arg2[%c0_1, %c0_2] : memref<32x36xf32, #tpu.memory_space<vmem>>, vector<32x36xf32>
    %cst = arith.constant dense<0.000000e+00> : vector<128x36xf32>
    %2 = tpu.matmul %0, %1, %cst {dimension_numbers = #tpu.dot_dimension_numbers<[1], [0], [0], [1], [0, 0, 1, 1], [], []>} : vector<128x32xf32>, vector<32x36xf32>, vector<128x36xf32> -> vector<128x36xf32>
    %c0_3 = arith.constant 0 : index
    %c0_4 = arith.constant 0 : index
    %3 = vector.load %arg3[%c0_3, %c0_4] : memref<1x36xf32, #tpu.memory_space<vmem>>, vector<1x36xf32>
    %4 = vector.broadcast %3 : vector<1x36xf32> to vector<128x36xf32>
    %5 = arith.addf %2, %4 : vector<128x36xf32>
    %6 = vector.extract_strided_slice %5 {offsets = [0, 0], sizes = [128, 32], strides = [1, 1]} : vector<128x36xf32> to vector<128x32xf32>
    %7 = vector.extract_strided_slice %5 {offsets = [0, 32], sizes = [128, 4], strides = [1, 1]} : vector<128x36xf32> to vector<128x4xf32>
    %8 = vector.shape_cast %7 : vector<128x4xf32> to vector<8x16x4xf32>
    %c0_5 = arith.constant 0 : index
    %c0_6 = arith.constant 0 : index
    %9 = vector.load %arg4[%c0_5, %c0_6] : memref<1x4xf32, #tpu.memory_space<vmem>>, vector<1x4xf32>
    %cst_7 = arith.constant dense<0xFF800000> : vector<8x4xf32>
    %10 = vector.multi_reduction <maximumf>, %8, %cst_7 [1] : vector<8x16x4xf32> to vector<8x4xf32>
    %11 = vector.shape_cast %10 : vector<8x4xf32> to vector<8x1x4xf32>
    %12 = vector.shape_cast %9 : vector<1x4xf32> to vector<1x1x4xf32>
    %13 = vector.broadcast %12 : vector<1x1x4xf32> to vector<8x1x4xf32>
    %14 = arith.maximumf %11, %13 : vector<8x1x4xf32>
    %15 = vector.broadcast %14 : vector<8x1x4xf32> to vector<8x16x4xf32>
    %16 = arith.subf %8, %15 : vector<8x16x4xf32>
    %17 = math.exp %16 : vector<8x16x4xf32>
    %18 = vector.shape_cast %9 : vector<1x4xf32> to vector<1x1x4xf32>
    %19 = vector.broadcast %18 : vector<1x1x4xf32> to vector<8x1x4xf32>
    %20 = arith.subf %19, %14 : vector<8x1x4xf32>
    %21 = math.exp %20 : vector<8x1x4xf32>
    %cst_8 = arith.constant dense<0.000000e+00> : vector<8x4xf32>
    %22 = vector.multi_reduction <add>, %17, %cst_8 [1] : vector<8x16x4xf32> to vector<8x4xf32>
    %23 = vector.shape_cast %22 : vector<8x4xf32> to vector<8x1x4xf32>
    %24 = arith.addf %23, %21 : vector<8x1x4xf32>
    %cst_9 = arith.constant 1.000000e+00 : f32
    %25 = vector.broadcast %cst_9 : f32 to vector<8x1x4xf32>
    %26 = arith.divf %25, %24 : vector<8x1x4xf32>
    %27 = vector.broadcast %26 : vector<8x1x4xf32> to vector<8x16x4xf32>
    %28 = arith.mulf %17, %27 : vector<8x16x4xf32>
    %29 = vector.shape_cast %28 : vector<8x16x4xf32> to vector<128x4xf32>
    %30 = arith.mulf %21, %26 : vector<8x1x4xf32>
    %31 = vector.shape_cast %30 : vector<8x1x4xf32> to vector<8x4xf32>
    %c0_10 = arith.constant 0 : index
    %c0_11 = arith.constant 0 : index
    %32 = vector.load %arg6[%c0_10, %c0_11] : memref<4x32xf32, #tpu.memory_space<vmem>>, vector<4x32xf32>
    %cst_12 = arith.constant dense<0.000000e+00> : vector<128x32xf32>
    %33 = tpu.matmul %29, %32, %cst_12 {dimension_numbers = #tpu.dot_dimension_numbers<[1], [0], [0], [1], [0, 0, 1, 1], [], []>} : vector<128x4xf32>, vector<4x32xf32>, vector<128x32xf32> -> vector<128x32xf32>
    %34 = arith.mulf %33, %6 : vector<128x32xf32>
    %35 = vector.shape_cast %34 : vector<128x32xf32> to vector<8x16x32xf32>
    %cst_13 = arith.constant dense<0.000000e+00> : vector<8x32xf32>
    %36 = vector.multi_reduction <add>, %35, %cst_13 [1] : vector<8x16x32xf32> to vector<8x32xf32>
    %cst_14 = arith.constant dense<0.000000e+00> : vector<8x32xf32>
    %37 = tpu.matmul %31, %32, %cst_14 {dimension_numbers = #tpu.dot_dimension_numbers<[1], [0], [0], [1], [0, 0, 1, 1], [], []>} : vector<8x4xf32>, vector<4x32xf32>, vector<8x32xf32> -> vector<8x32xf32>
    %c0_15 = arith.constant 0 : index
    %c0_16 = arith.constant 0 : index
    %38 = vector.load %arg5[%c0_15, %c0_16] : memref<1x32xf32, #tpu.memory_space<vmem>>, vector<1x32xf32>
    %39 = vector.broadcast %38 : vector<1x32xf32> to vector<8x32xf32>
    %40 = arith.mulf %37, %39 : vector<8x32xf32>
    %41 = arith.addf %36, %40 : vector<8x32xf32>
    %c0_17 = arith.constant 0 : index
    %c0_18 = arith.constant 0 : index
    %42 = vector.load %arg7[%c0_17, %c0_18] : memref<32x32xf32, #tpu.memory_space<vmem>>, vector<32x32xf32>
    %cst_19 = arith.constant dense<0.000000e+00> : vector<8x32xf32>
    %43 = tpu.matmul %41, %42, %cst_19 {dimension_numbers = #tpu.dot_dimension_numbers<[1], [0], [0], [1], [0, 0, 1, 1], [], []>} : vector<8x32xf32>, vector<32x32xf32>, vector<8x32xf32> -> vector<8x32xf32>
    %c0_20 = arith.constant 0 : index
    %c0_21 = arith.constant 0 : index
    %44 = vector.load %arg8[%c0_20, %c0_21] : memref<1x32xf32, #tpu.memory_space<vmem>>, vector<1x32xf32>
    %45 = vector.broadcast %44 : vector<1x32xf32> to vector<8x32xf32>
    %46 = arith.addf %43, %45 : vector<8x32xf32>
    %c0_22 = arith.constant 0 : index
    %c0_23 = arith.constant 0 : index
    %47 = vector.load %arg9[%c0_22, %c0_23] : memref<8x32xf32, #tpu.memory_space<vmem>>, vector<8x32xf32>
    tpu.vector_store %arg9[%c0_22, %c0_23], %46 {strides = array<i32>} : memref<8x32xf32, #tpu.memory_space<vmem>>, vector<8x32xf32>,
    return
  }
  func.func @transform_0(%arg0: i32) -> (i32, i32) {
    %c0_i32 = arith.constant 0 : i32
    %c0_i32_0 = arith.constant 0 : i32
    return %arg0, %c0_i32 : i32, i32
  }
  func.func @transform_1(%arg0: i32) -> (i32, i32) {
    %c0_i32 = arith.constant 0 : i32
    %c0_i32_0 = arith.constant 0 : i32
    %c0_i32_1 = arith.constant 0 : i32
    return %c0_i32, %c0_i32_0 : i32, i32
  }
  func.func @transform_2(%arg0: i32) -> (i32, i32) {
    %c0_i32 = arith.constant 0 : i32
    %c0_i32_0 = arith.constant 0 : i32
    %c0_i32_1 = arith.constant 0 : i32
    return %c0_i32, %c0_i32_0 : i32, i32
  }
  func.func @transform_3(%arg0: i32) -> (i32, i32) {
    %c0_i32 = arith.constant 0 : i32
    %c0_i32_0 = arith.constant 0 : i32
    %c0_i32_1 = arith.constant 0 : i32
    return %c0_i32, %c0_i32_0 : i32, i32
  }
  func.func @transform_4(%arg0: i32) -> (i32, i32) {
    %c0_i32 = arith.constant 0 : i32
    %c0_i32_0 = arith.constant 0 : i32
    %c0_i32_1 = arith.constant 0 : i32
    return %c0_i32, %c0_i32_0 : i32, i32
  }
  func.func @transform_5(%arg0: i32) -> (i32, i32) {
    %c0_i32 = arith.constant 0 : i32
    %c0_i32_0 = arith.constant 0 : i32
    %c0_i32_1 = arith.constant 0 : i32
    return %c0_i32, %c0_i32_0 : i32, i32
  }
  func.func @transform_6(%arg0: i32) -> (i32, i32) {
    %c0_i32 = arith.constant 0 : i32
    %c0_i32_0 = arith.constant 0 : i32
    %c0_i32_1 = arith.constant 0 : i32
    return %c0_i32, %c0_i32_0 : i32, i32
  }
  func.func @transform_7(%arg0: i32) -> (i32, i32) {
    %c0_i32 = arith.constant 0 : i32
    %c0_i32_0 = arith.constant 0 : i32
    %c0_i32_1 = arith.constant 0 : i32
    return %c0_i32, %c0_i32_0 : i32, i32
  }
  func.func @transform_8(%arg0: i32) -> (i32, i32) {
    %c0_i32 = arith.constant 0 : i32
    %c0_i32_0 = arith.constant 0 : i32
    return %arg0, %c0_i32 : i32, i32
  }
}

</mosaic_0001>

<bundles_post_ra>
// kernel: tpu_custom_call.1
= control target key start
LH: loop header
LB: loop body
LE: loop exit
PB: predicated region body
PF: predicated region fallthrough
CT: control target
= control target key end

     0   :  { %vm57_vm0 = vcmask 261120   ;;  %v326_v3 = vlaneseq  ;;  %s2429_s0 = inlined_call_operand.vmem [shape: f32[128,32], index: 0, kind: input, shape index: {}]   ;;  %s2430_s1 = inlined_call_operand.vmem [shape: f32[32,36], index: 1, kind: input, shape index: {}]   ;;  %s2431_s2 = inlined_call_operand.vmem [shape: f32[1,36], index: 2, kind: input, shape index: {}]   ;;  %s2432_s3 = inlined_call_operand.vmem [shape: f32[1,4], index: 3, kind: input, shape index: {}]   ;;  %s2433_s4 = inlined_call_operand.vmem [shape: f32[1,32], index: 4, kind: input, shape index: {}]   ;;  %s2434_s5 = inlined_call_operand.vmem [shape: f32[4,32], index: 5, kind: input, shape index: {}]   ;;  %s2435_s6 = inlined_call_operand.vmem [shape: f32[32,32], index: 6, kind: input, shape index: {}]   ;;  %s2436_s7 = inlined_call_operand.vmem [shape: f32[1,32], index: 7, kind: input, shape index: {}]   ;;  %s2437_s8 = inlined_call_operand.hbm [shape: f32[8,32], index: 8, kind: output, shape index: {}]  }
   0x1   :  { %v46_v0 = vld [vmem:[%s2430_s1] sm:$0xff]  ;;  %v47_v1 = vld [vmem:[%s2430_s1 + $0x8] sm:$0xff]  ;;  %v48_v2 = vld [vmem:[%s2430_s1 + $0x10] sm:$0xff] }
   0x2   :  { %v1713_v4 = vpack.c.bf16 %v47_v1, %v46_v0  ;;  %v49_v5 = vld [vmem:[%s2430_s1 + $0x18] sm:$0xff]  ;;  %v30_v6 = vld [vmem:[%s2429_s0] sm:$0xff]  ;;  %v1890_v8 = vshrl.u32 %v326_v3, 7 }
   0x3   :  { %v1717_v7 = vpack.c.bf16 %v49_v5, %v48_v2  ;;  %1647 = vmatprep.mubr.msk.f32.mxu0 %vm57_vm0, %v30_v6  ;;  %v1898_v10 = vld [vmem:[%s2432_s3] sm:$0x1] }
   0x4   :  { %1714 = vmatprep.subr.bf16.mxu0 %v1713_v4  ;;  %v1893_v9 = vsub.s32 0, %v1890_v8 }
   0x5   :  { %1716 = vmatpush3.bf16.msra.mxu0 %v1713_v4 }
   0x6   :  { %1718 = vmatprep.subr.bf16.mxu0 %v1717_v7  ;;  %v329_v11 = vrot.slane %v1898_v10, %v1893_v9 }
   0x7   :  { %13 = vsyncpa [#allocation3], 0  ;;  %v31_v12 = vld [vmem:[%s2429_s0 + $0x8] sm:$0xff]  ;;  %v32_v13 = vld [vmem:[%s2429_s0 + $0x10] sm:$0xff]  ;;  %s1822_s20 = smov 32   ;;  %vm252_vm1 = vcmask 294144  }
   0x8   :  { %330 = vrot.lane.b32.xlu0 %v329_v11, %s1822_s20  ;;  %v33_v14 = vld [vmem:[%s2429_s0 + $0x18] sm:$0xff]  ;;  %v34_v15 = vld [vmem:[%s2429_s0 + $0x20] sm:$0xff]  ;;  %v35_v16 = vld [vmem:[%s2429_s0 + $0x28] sm:$0xff]  ;;  %v1823_v47 = vmov 1966171168   ;;  %vm1031_vm2 = vcmask 1043456  }
   0x9   :  { %1720 = vmatpush3.bf16.msra.mxu0 %v1717_v7  ;;  %v36_v17 = vld [vmem:[%s2429_s0 + $0x30] sm:$0xff]  ;;  %v37_v18 = vld [vmem:[%s2429_s0 + $0x38] sm:$0xff]  ;;  %v38_v19 = vld [vmem:[%s2429_s0 + $0x40] sm:$0xff]  ;;  %v430_v48 = vunpack.c.l.s4 %v1823_v47  ;;  %vm1826_vm3 = vmmov 0   ;;  %vm998_vm4 = vcmask 31744   ;;  %vm1449_vm5 = vcmask 1041409  }
   0xa   :  { %v39_v20 = vld [vmem:[%s2429_s0 + $0x48] sm:$0xff]  ;;  %v40_v21 = vld [vmem:[%s2429_s0 + $0x50] sm:$0xff]  ;;  %v41_v22 = vld [vmem:[%s2429_s0 + $0x58] sm:$0xff]  ;;  %vm1452_vm6 = vcmask 1042434   ;;  %vm1455_vm7 = vcmask 1043459   ;;  %vm1458_vm8 = vcmask 1044484  }
   0xb   :  { %v42_v23 = vld [vmem:[%s2429_s0 + $0x60] sm:$0xff]  ;;  %v43_v24 = vld [vmem:[%s2429_s0 + $0x68] sm:$0xff]  ;;  %v44_v25 = vld [vmem:[%s2429_s0 + $0x70] sm:$0xff]  ;;  %v431_v60 = vunpack.c.0.s8 %v430_v48  ;;  %vm1461_vm9 = vcmask 1045509   ;;  %vm1464_vm10 = vcmask 1046534   ;;  %vm1467_vm11 = vcmask 1047559  }
   0xc   :  { %1648 = vmatmul.mubr.msk.f32.vlgmr.msra.gmra.mrb[0].mxu0 %vm57_vm0, %v31_v12  ;;  %v45_v26 = vld [vmem:[%s2429_s0 + $0x78] sm:$0xff]  ;;  %v1966_v27 = vld [vmem:[%s2431_s2] ss:$0 sm:$0xff]  ;;  %s1824_s0 = smov 96   ;;  %s1828_s12 = smov [#allocation2]  }
   0xd   :  { %1650 = vmatprep.mubr.msk.f32.mxu0 %vm57_vm0, %v32_v13  ;;  %v2014_v13 = vsub.s32 %v431_v60, %v1890_v8  ;;  %s1548_s13 = sshll.u32 %s1828_s12, 4  ;;  %s1549_s13 = int_to_ptr.vmem [resolvable:$true] %s1548_s13 }
   0xe   :  { %s1798_s14 = scalar_lea.vmem %s1549_s13, 128  ;;  %p1803_p1 = scmp.lt.s32.totalorder %s1549_s13, %s1549_s13 }
   0xf   :  { %p1799_p0 = scmp.ne.s32.totalorder %s1549_s13, %s1798_s14  ;;  %p1804_p2 = scmp.lt.s32.totalorder %s1798_s14, %s1798_s14 }
  0x10   :  { %1651 = vmatmul.mubr.msk.f32.gmra.mrb[2].mxu0 %vm57_vm0, %v33_v14 }
  0x11   :  { %1653 = vmatprep.mubr.msk.f32.mxu0 %vm57_vm0, %v34_v15  ;;  %p1805_p3 = por %p1804_p2, %p1803_p1 }
  0x13   :  { %p1806_p4 = pnand %p1805_p3, %p1799_p0 }
  0x14   :  { %1654 = vmatmul.mubr.msk.f32.gmra.mrb[4].mxu0 %vm57_vm0, %v35_v16 }
  0x15   :  { %1656 = vmatprep.mubr.msk.f32.mxu0 %vm57_vm0, %v36_v17 }
  0x18   :  { %1657 = vmatmul.mubr.msk.f32.gmra.mrb[6].mxu0 %vm57_vm0, %v37_v18 }
  0x19   :  { %1659 = vmatprep.mubr.msk.f32.mxu0 %vm57_vm0, %v38_v19 }
  0x1c   :  { %1660 = vmatmul.mubr.msk.f32.gmra.mrb[8].mxu0 %vm57_vm0, %v39_v20 }
  0x1d   :  { %1662 = vmatprep.mubr.msk.f32.mxu0 %vm57_vm0, %v40_v21 }
  0x20   :  { %1663 = vmatmul.mubr.msk.f32.gmra.mrb[10].mxu0 %vm57_vm0, %v41_v22 }
  0x21   :  { %1665 = vmatprep.mubr.msk.f32.mxu0 %vm57_vm0, %v42_v23 }
  0x24   :  { %1666 = vmatmul.mubr.msk.f32.gmra.mrb[12].mxu0 %vm57_vm0, %v43_v24 }
  0x25   :  { %1668 = vmatprep.mubr.msk.f32.mxu0 %vm57_vm0, %v44_v25 }
  0x28   :  { %1669 = vmatmul.mubr.msk.f32.gmra.mrb[14].mxu0 %vm57_vm0, %v45_v26 }
  0x7a   :  { %v2008_v4 = vpop.permute.xlu0 %330 }
  0xdf   :  { %v1649_v28 = vpop.f32.mrb[0].mxu0 }
  0xe0   :  { %v1969_v29 = vadd.f32 %v1649_v28, %v1966_v27  ;;  %v172_v30 = vpop.f32.mrb[1].mxu0 }
  0xe1   :  { %v1972_v31 = vadd.f32 %v1966_v27, %v172_v30 }
  0xe2   :  { %v254_v32 = vsel %vm252_vm1, %v1969_v29, -inf }
  0xe3   :  { %v253_v33 = vsel %vm252_vm1, %v1972_v31, -inf  ;;  %v1652_v34 = vpop.f32.mrb[2].mxu0 }
  0xe4   :  { %v255_v35 = vmax.f32 %v253_v33, %v254_v32  ;;  %v1979_v36 = vadd.f32 %v1652_v34, %v1966_v27  ;;  %v182_v37 = vpop.f32.mrb[3].mxu0 }
  0xe5   :  { %v1982_v38 = vadd.f32 %v1966_v27, %v182_v37 }
  0xe6   :  { %v256_v39 = vrot.slane %v255_v35, 4  ;;  %v263_v40 = vsel %vm252_vm1, %v1979_v36, -inf }
  0xe7   :  { %v262_v41 = vsel %vm252_vm1, %v1982_v38, -inf  ;;  %v1655_v42 = vpop.f32.mrb[4].mxu0 }
  0xe8   :  { %v257_v43 = vmax.f32 %v255_v35, %v256_v39  ;;  %v264_v44 = vmax.f32 %v262_v41, %v263_v40  ;;  %v1989_v45 = vadd.f32 %v1655_v42, %v1966_v27  ;;  %v192_v46 = vpop.f32.mrb[5].mxu0 }
  0xe9   :  { %v1992_v49 = vadd.f32 %v1966_v27, %v192_v46 }
  0xea   :  { %v258_v50 = vrot.slane %v257_v43, 2  ;;  %v265_v51 = vrot.slane %v264_v44, 4  ;;  %v272_v52 = vsel %vm252_vm1, %v1989_v45, -inf }
  0xeb   :  { %v271_v53 = vsel %vm252_vm1, %v1992_v49, -inf  ;;  %v1658_v54 = vpop.f32.mrb[6].mxu0 }
  0xec   :  { %v259_v55 = vmax.f32 %v257_v43, %v258_v50  ;;  %v266_v56 = vmax.f32 %v264_v44, %v265_v51  ;;  %v273_v57 = vmax.f32 %v271_v53, %v272_v52  ;;  %v1999_v58 = vadd.f32 %v1658_v54, %v1966_v27  ;;  %v202_v59 = vpop.f32.mrb[7].mxu0 }
  0xed   :  { %v2002_v61 = vadd.f32 %v1966_v27, %v202_v59 }
  0xee   :  { %v267_v62 = vrot.slane %v266_v56, 2  ;;  %v274_v63 = vrot.slane %v273_v57, 4  ;;  %v281_v0 = vsel %vm252_vm1, %v1999_v58, -inf  ;;  %v260_v1 = vrot.slane %v259_v55, 1 }
  0xef   :  { %v280_v2 = vsel %vm252_vm1, %v2002_v61, -inf  ;;  %v1661_v3 = vpop.f32.mrb[8].mxu0 }
  0xf0   :  { %v275_v5 = vmax.f32 %v273_v57, %v274_v63  ;;  %v282_v6 = vmax.f32 %v280_v2, %v281_v0  ;;  %v2011_v7 = vadd.f32 %v1661_v3, %v1966_v27  ;;  %v212_v11 = vpop.f32.mrb[9].mxu0  ;;  %v261_v12 = vmax.f32 %v259_v55, %v260_v1 }
  0xf1   :  { %v2017_v14 = vadd.f32 %v1966_v27, %v212_v11  ;;  %v268_v15 = vmax.f32 %v266_v56, %v267_v62 }
  0xf2   :  { %v276_v16 = vrot.slane %v275_v5, 2  ;;  %v283_v17 = vrot.slane %v282_v6, 4  ;;  %v290_v18 = vsel %vm252_vm1, %v2011_v7, -inf  ;;  %v333_v19 = vmax.f32 %v261_v12, %v2008_v4 }
  0xf3   :  { %v289_v20 = vsel %vm252_vm1, %v2017_v14, -inf  ;;  %v1664_v21 = vpop.f32.mrb[10].mxu0  ;;  %v269_v22 = vrot.slane %v268_v15, 1 }
  0xf4   :  { %v277_v23 = vmax.f32 %v275_v5, %v276_v16  ;;  %v284_v24 = vmax.f32 %v282_v6, %v283_v17  ;;  %v291_v8 = vmax.f32 %v289_v20, %v290_v18  ;;  %v2025_v25 = vadd.f32 %v1664_v21, %v1966_v27  ;;  %v222_v26 = vpop.f32.mrb[11].mxu0 }
  0xf5   :  { %v2028_v28 = vadd.f32 %v1966_v27, %v222_v26  ;;  %v435_v30 = vrot.slane %v333_v19, %v2014_v13  ;;  %v344_v32 = vrot.slane %v333_v19, %v1893_v9  ;;  %v270_v33 = vmax.f32 %v268_v15, %v269_v22 }
  0xf6   :  { %2444 = vst [vmem:[#allocation5_spill] sm:$0xff] %v2025_v25  ;;  %v285_v34 = vrot.slane %v284_v24, 2  ;;  %v292_v35 = vrot.slane %v291_v8, 4  ;;  %v299_v37 = vsel %vm252_vm1, %v2025_v25, -inf  ;;  %v278_v39 = vrot.slane %v277_v23, 1 }
  0xf7   :  { %2445 = vst [vmem:[#allocation6_spill] sm:$0xff] %v2028_v28  ;;  %v298_v40 = vsel %vm252_vm1, %v2028_v28, -inf  ;;  %v1667_v41 = vpop.f32.mrb[12].mxu0  ;;  %v442_v42 = vrot.slane %v435_v30, %v2014_v13  ;;  %v373_v43 = vsub.f32 %v1972_v31, %v344_v32  ;;  %v374_v44 = vsub.f32 %v1969_v29, %v344_v32 }
  0xf8   :  { %v286_v46 = vmax.f32 %v284_v24, %v285_v34  ;;  %v293_v47 = vmax.f32 %v291_v8, %v292_v35  ;;  %v300_v48 = vmax.f32 %v298_v40, %v299_v37  ;;  %v2040_v50 = vadd.f32 %v1667_v41, %v1966_v27  ;;  %v232_v51 = vpop.f32.mrb[13].mxu0 }
  0xf9   :  { %v2043_v52 = vadd.f32 %v1966_v27, %v232_v51  ;;  %541 = vrot.lane.b32.xlu0 %v442_v42, %s1824_s0  ;;  %v389_v53 = vmul.f32 1.442695, %v373_v43  ;;  %v391_v54 = vmul.f32 1.442695, %v374_v44  ;;  %v334_v55 = vmax.f32 %v270_v33, %v2008_v4 }
  0xfa   :  { %2446 = vst [vmem:[#allocation7_spill] sm:$0xff] %v2040_v50  ;;  %v294_v56 = vrot.slane %v293_v47, 2  ;;  %v301_v57 = vrot.slane %v300_v48, 4  ;;  %v308_v59 = vsel %vm252_vm1, %v2040_v50, -inf  ;;  %v279_v60 = vmax.f32 %v277_v23, %v278_v39 }
  0xfb   :  { %2447 = vst [vmem:[#allocation8_spill] sm:$0xff] %v2043_v52  ;;  %v307_v62 = vsel %vm252_vm1, %v2043_v52, -inf  ;;  %1734 = vpow2.f32 %v389_v53  ;;  %v1670_v63 = vpop.f32.mrb[14].mxu0  ;;  %v449_v0 = vrot.slane %v334_v55, %v2014_v13  ;;  %v348_v1 = vrot.slane %v334_v55, %v1893_v9 }
  0xfc   :  { %v295_v2 = vmax.f32 %v293_v47, %v294_v56  ;;  %v302_v3 = vmax.f32 %v300_v48, %v301_v57  ;;  %v309_v5 = vmax.f32 %v307_v62, %v308_v59  ;;  %1736 = vpow2.f32 %v391_v54  ;;  %v242_v6 = vpop.f32.mrb[15].mxu0 }
  0xfd   :  { %v2054_v11 = vadd.f32 %v1670_v63, %v1966_v27  ;;  %v2057_v12 = vadd.f32 %v1966_v27, %v242_v6  ;;  %v456_v15 = vrot.slane %v449_v0, %v2014_v13  ;;  %v375_v16 = vsub.f32 %v1982_v38, %v348_v1 }
  0xfe   :  { %v303_v17 = vrot.slane %v302_v3, 2  ;;  %v310_v18 = vrot.slane %v309_v5, 4  ;;  %v376_v19 = vsub.f32 %v1979_v36, %v348_v1  ;;  %v335_v20 = vmax.f32 %v279_v60, %v2008_v4 }
  0xff   :  { %2448 = vst [vmem:[#allocation9_spill] sm:$0xff] %v2054_v11  ;;  %2449 = vst [vmem:[#allocation10_spill] sm:$0xff] %v2057_v12  ;;  %v317_v21 = vsel %vm252_vm1, %v2054_v11, -inf  ;;  %v316_v22 = vsel %vm252_vm1, %v2057_v12, -inf  ;;  %543 = vrot.lane.b32.xlu1 %v456_v15, %s1824_s0  ;;  %v393_v27 = vmul.f32 1.442695, %v375_v16 }
 0x100   :  { %v287_v23 = vrot.slane %v286_v46, 1  ;;  %v304_v24 = vmax.f32 %v302_v3, %v303_v17  ;;  %v311_v8 = vmax.f32 %v309_v5, %v310_v18  ;;  %v318_v26 = vmax.f32 %v316_v22, %v317_v21 }
 0x101   :  { %v395_v30 = vmul.f32 1.442695, %v376_v19  ;;  %1738 = vpow2.f32 %v393_v27  ;;  %v352_v32 = vrot.slane %v335_v20, %v1893_v9  ;;  %v463_v33 = vrot.slane %v335_v20, %v2014_v13 }
 0x102   :  { %v288_v34 = vmax.f32 %v286_v46, %v287_v23  ;;  %v305_v35 = vrot.slane %v304_v24, 1  ;;  %v312_v37 = vrot.slane %v311_v8, 2  ;;  %v319_v39 = vrot.slane %v318_v26, 4 }
 0x103   :  { %1740 = vpow2.f32 %v395_v30  ;;  %v377_v40 = vsub.f32 %v1992_v49, %v352_v32  ;;  %v378_v41 = vsub.f32 %v1989_v45, %v352_v32  ;;  %v470_v42 = vrot.slane %v463_v33, %v2014_v13 }
 0x104   :  { %v336_v43 = vmax.f32 %v288_v34, %v2008_v4  ;;  %v306_v44 = vmax.f32 %v304_v24, %v305_v35  ;;  %v313_v47 = vmax.f32 %v311_v8, %v312_v37  ;;  %v320_v48 = vmax.f32 %v318_v26, %v319_v39 }
 0x105   :  { %v296_v51 = vrot.slane %v295_v2, 1  ;;  %v2074_v53 = vpop.eup %1734  ;;  %v397_v54 = vmul.f32 1.442695, %v377_v40  ;;  %v399_v46 = vmul.f32 1.442695, %v378_v41  ;;  %545 = vrot.lane.b32.xlu1 %v470_v42, %s1824_s0 }
 0x106   :  { %v356_v55 = vrot.slane %v336_v43, %v1893_v9  ;;  %v477_v56 = vrot.slane %v336_v43, %v2014_v13  ;;  %v2079_v57 = vpop.eup %1736  ;;  %v338_v59 = vmax.f32 %v306_v44, %v2008_v4  ;;  %v314_v60 = vrot.slane %v313_v47, 1 }
 0x107   :  { %v321_v62 = vrot.slane %v320_v48, 2  ;;  %v297_v63 = vmax.f32 %v295_v2, %v296_v51  ;;  %1742 = vpow2.f32 %v397_v54 }
 0x108   :  { %v379_v0 = vsub.f32 %v2002_v61, %v356_v55  ;;  %v380_v1 = vsub.f32 %v1999_v58, %v356_v55  ;;  %v484_v3 = vrot.slane %v477_v56, %v2014_v13  ;;  %v364_v5 = vrot.slane %v338_v59, %v1893_v9 }
 0x109   :  { %v315_v6 = vmax.f32 %v313_v47, %v314_v60  ;;  %v322_v15 = vmax.f32 %v320_v48, %v321_v62  ;;  %1744 = vpow2.f32 %v399_v46  ;;  %v337_v18 = vmax.f32 %v297_v63, %v2008_v4 }
 0x10a   :  { %v401_v16 = vmul.f32 1.442695, %v379_v0  ;;  %v403_v17 = vmul.f32 1.442695, %v380_v1  ;;  %547 = vrot.lane.b32.xlu0 %v484_v3, %s1824_s0  ;;  %v505_v2 = vrot.slane %v338_v59, %v2014_v13  ;;  %v383_v19 = vsub.f32 %v2028_v28, %v364_v5 }
 0x10b   :  { %v384_v20 = vsub.f32 %v2025_v25, %v364_v5  ;;  %v339_v21 = vmax.f32 %v315_v6, %v2008_v4  ;;  %v323_v22 = vrot.slane %v322_v15, 1  ;;  %v2092_v27 = vpop.eup %1738  ;;  %v360_v23 = vrot.slane %v337_v18, %v1893_v9 }
 0x10c   :  { %1746 = vpow2.f32 %v401_v16  ;;  %v491_v24 = vrot.slane %v337_v18, %v2014_v13  ;;  %v512_v8 = vrot.slane %v505_v2, %v2014_v13  ;;  %v409_v30 = vmul.f32 1.442695, %v383_v19 }
 0x10d   :  { %v2097_v26 = vpop.eup %1740  ;;  %v411_v32 = vmul.f32 1.442695, %v384_v20  ;;  %v368_v33 = vrot.slane %v339_v21, %v1893_v9  ;;  %v324_v34 = vmax.f32 %v322_v15, %v323_v22  ;;  %1748 = vpow2.f32 %v403_v17 }
 0x10e   :  { %v381_v35 = vsub.f32 %v2017_v14, %v360_v23  ;;  %v382_v37 = vsub.f32 %v2011_v7, %v360_v23  ;;  %v498_v39 = vrot.slane %v491_v24, %v2014_v13  ;;  %551 = vrot.lane.b32.xlu0 %v512_v8, %s1824_s0  ;;  %1750 = vpow2.f32 %v409_v30 }
 0x10f   :  { %v385_v40 = vsub.f32 %v2043_v52, %v368_v33  ;;  %v386_v41 = vsub.f32 %v2040_v50, %v368_v33  ;;  %v340_v42 = vmax.f32 %v324_v34, %v2008_v4  ;;  %1752 = vpow2.f32 %v411_v32 }
 0x110   :  { %v405_v43 = vmul.f32 1.442695, %v381_v35  ;;  %v407_v44 = vmul.f32 1.442695, %v382_v37  ;;  %549 = vrot.lane.b32.xlu1 %v498_v39, %s1824_s0  ;;  %v519_v47 = vrot.slane %v339_v21, %v2014_v13  ;;  %v589_v4 = vsel %vm252_vm1, %v2074_v53, 0.0 }
 0x111   :  { %v413_v48 = vmul.f32 1.442695, %v385_v40  ;;  %v415_v51 = vmul.f32 1.442695, %v386_v41  ;;  %v372_v54 = vrot.slane %v340_v42, %v1893_v9  ;;  %v533_v46 = vrot.slane %v340_v42, %v2014_v13  ;;  %v2111_v55 = vpop.eup %1742 }
 0x112   :  { %1754 = vpow2.f32 %v405_v43  ;;  %v526_v56 = vrot.slane %v519_v47, %v2014_v13  ;;  %v590_v59 = vsel %vm252_vm1, %v2079_v57, 0.0  ;;  %v598_v3 = vsel %vm252_vm1, %v2092_v27, 0.0 }
 0x113   :  { %v2118_v60 = vpop.eup %1744  ;;  %1756 = vpow2.f32 %v413_v48  ;;  %v387_v62 = vsub.f32 %v2057_v12, %v372_v54  ;;  %v388_v63 = vsub.f32 %v2054_v11, %v372_v54  ;;  %v540_v0 = vrot.slane %v533_v46, %v2014_v13 }
 0x114   :  { %1758 = vpow2.f32 %v415_v51  ;;  %553 = vrot.lane.b32.xlu1 %v526_v56, %s1824_s0  ;;  %v2124_v1 = vadd.f32 %v590_v59, %v589_v4  ;;  %v599_v5 = vsel %vm252_vm1, %v2097_v26, 0.0  ;;  %v607_v18 = vsel %vm252_vm1, %v2111_v55, 0.0 }
 0x115   :  { %v417_v6 = vmul.f32 1.442695, %v387_v62  ;;  %v419_v15 = vmul.f32 1.442695, %v388_v63  ;;  %1760 = vpow2.f32 %v407_v44  ;;  %555 = vrot.lane.b32.xlu0 %v540_v0, %s1824_s0  ;;  %v2131_v16 = vadd.f32 %v599_v5, %v598_v3 }
 0x116   :  { %v2133_v17 = vpop.eup %1746  ;;  %v608_v2 = vsel %vm252_vm1, %v2118_v60, 0.0 }
 0x117   :  { %1762 = vpow2.f32 %v417_v6  ;;  %v2139_v19 = vadd.f32 %v608_v2, %v607_v18  ;;  %v616_v20 = vsel %vm252_vm1, %v2133_v17, 0.0  ;;  %v2143_v21 = vpop.eup %1748 }
 0x118   :  { %1764 = vpow2.f32 %v419_v15  ;;  %v2145_v22 = vpop.eup %1750  ;;  %v617_v23 = vsel %vm252_vm1, %v2143_v21, 0.0 }
 0x119   :  { %v2149_v24 = vpop.eup %1752  ;;  %v2151_v8 = vadd.f32 %v617_v23, %v616_v20  ;;  %v634_v30 = vsel %vm252_vm1, %v2145_v22, 0.0 }
 0x11a   :  { %v635_v32 = vsel %vm252_vm1, %v2149_v24, 0.0 }
 0x11b   :  { %v2159_v34 = vadd.f32 %v635_v32, %v634_v30 }
 0x11c   :  { %v2157_v33 = vpop.eup %1754 }
 0x11d   :  { %v2161_v35 = vpop.eup %1756  ;;  %v625_v37 = vsel %vm252_vm1, %v2157_v33, 0.0 }
 0x11e   :  { %v2165_v39 = vpop.eup %1758  ;;  %v643_v40 = vsel %vm252_vm1, %v2161_v35, 0.0 }
 0x11f   :  { %v2169_v41 = vpop.eup %1760  ;;  %v644_v42 = vsel %vm252_vm1, %v2165_v39, 0.0 }
 0x120   :  { %v626_v43 = vsel %vm252_vm1, %v2169_v41, 0.0  ;;  %v2179_v48 = vadd.f32 %v644_v42, %v643_v40 }
 0x121   :  { %v2175_v44 = vpop.eup %1762  ;;  %v2177_v47 = vadd.f32 %v626_v43, %v625_v37 }
 0x122   :  { %v2181_v51 = vpop.eup %1764  ;;  %v652_v54 = vsel %vm252_vm1, %v2175_v44, 0.0 }
 0x123   :  { %v653_v46 = vsel %vm252_vm1, %v2181_v51, 0.0 }
 0x124   :  { %v2187_v56 = vadd.f32 %v653_v46, %v652_v54 }
 0x16b   :  { %v542_v4 = vpop.permute.xlu0 %541 }
 0x16c   :  { %v565_v59 = vsub.f32 %v1898_v10, %v542_v4 }
 0x16e   :  { %v573_v62 = vmul.f32 1.442695, %v565_v59 }
 0x170   :  { %1766 = vpow2.f32 %v573_v62 }
 0x171   :  { %v544_v63 = vpop.permute.xlu1 %543 }
 0x172   :  { %v566_v0 = vsub.f32 %v1898_v10, %v544_v63 }
 0x174   :  { %v575_v3 = vmul.f32 1.442695, %v566_v0 }
 0x176   :  { %1768 = vpow2.f32 %v575_v3 }
 0x177   :  { %v546_v5 = vpop.permute.xlu1 %545 }
 0x178   :  { %v567_v6 = vsub.f32 %v1898_v10, %v546_v5 }
 0x17a   :  { %v2192_v15 = vpop.eup %1766  ;;  %v577_v18 = vmul.f32 1.442695, %v567_v6 }
 0x17b   :  { %v672_v20 = vrot.slane %v2192_v15, %v1893_v9 }
 0x17c   :  { %v548_v2 = vpop.permute.xlu0 %547  ;;  %1770 = vpow2.f32 %v577_v18 }
 0x17d   :  { %v568_v23 = vsub.f32 %v1898_v10, %v548_v2  ;;  %701 = vrot.lane.b32.xlu1 %v672_v20, %s1822_s20 }
 0x17f   :  { %v579_v30 = vmul.f32 1.442695, %v568_v23 }
 0x180   :  { %v552_v32 = vpop.permute.xlu0 %551  ;;  %v2198_v37 = vpop.eup %1768 }
 0x181   :  { %1772 = vpow2.f32 %v579_v30  ;;  %v570_v40 = vsub.f32 %v1898_v10, %v552_v32  ;;  %v676_v43 = vrot.slane %v2198_v37, %v1893_v9 }
 0x182   :  { %v550_v42 = vpop.permute.xlu1 %549 }
 0x183   :  { %v569_v54 = vsub.f32 %v1898_v10, %v550_v42  ;;  %v583_v46 = vmul.f32 1.442695, %v570_v40  ;;  %703 = vrot.lane.b32.xlu0 %v676_v43, %s1822_s20 }
 0x185   :  { %v581_v4 = vmul.f32 1.442695, %v569_v54  ;;  %1774 = vpow2.f32 %v583_v46  ;;  %v2240_v46 = vld [vmem:[%s2434_s5] sm:$0xf] }
 0x186   :  { %v554_v59 = vpop.permute.xlu1 %553  ;;  %v2205_v62 = vpop.eup %1770  ;;  %1671 = vmatprep.subr.msk.mxu1 %vm1031_vm2, %v2240_v46 }
 0x187   :  { %1776 = vpow2.f32 %v581_v4  ;;  %v571_v63 = vsub.f32 %v1898_v10, %v554_v59  ;;  %v556_v0 = vpop.permute.xlu0 %555  ;;  %v680_v3 = vrot.slane %v2205_v62, %v1893_v9  ;;  %1672 = vmatpush3.msk.msra.mxu1 %vm1031_vm2, %v2240_v46  ;;  %v592_v4 = vrot.slane %v2124_v1, 4 }
 0x188   :  { %v572_v5 = vsub.f32 %v1898_v10, %v556_v0 }
 0x189   :  { %v585_v6 = vmul.f32 1.442695, %v571_v63  ;;  %705 = vrot.lane.b32.xlu1 %v680_v3, %s1822_s20  ;;  %v593_v59 = vadd.f32 %v592_v4, %v2124_v1  ;;  %v601_v63 = vrot.slane %v2131_v16, 4  ;;  %v637_v1 = vrot.slane %v2159_v34, 4 }
 0x18a   :  { %v587_v18 = vmul.f32 1.442695, %v572_v5 }
 0x18b   :  { %v2212_v2 = vpop.eup %1772  ;;  %1778 = vpow2.f32 %v585_v6  ;;  %v594_v0 = vrot.slane %v593_v59, 2  ;;  %v602_v3 = vadd.f32 %v601_v63, %v2131_v16  ;;  %v610_v6 = vrot.slane %v2139_v19, 4 }
 0x18c   :  { %1780 = vpow2.f32 %v587_v18  ;;  %v684_v20 = vrot.slane %v2212_v2, %v1893_v9  ;;  %v628_v16 = vrot.slane %v2177_v47, 4 }
 0x18d   :  { %v595_v5 = vadd.f32 %v594_v0, %v593_v59  ;;  %v603_v18 = vrot.slane %v602_v3, 2  ;;  %v638_v0 = vadd.f32 %v637_v1, %v2159_v34 }
 0x18e   :  { %707 = vrot.lane.b32.xlu0 %v684_v20, %s1822_s20 }
 0x18f   :  { %v2217_v23 = vpop.eup %1774  ;;  %v596_v20 = vrot.slane %v595_v5, 1 }
 0x190   :  { %v692_v30 = vrot.slane %v2217_v23, %v1893_v9 }
 0x191   :  { %v2221_v32 = vpop.eup %1776 }
 0x192   :  { %v688_v10 = vrot.slane %v2221_v32, %v1893_v9  ;;  %711 = vrot.lane.b32.xlu0 %v692_v30, %s1822_s20  ;;  %v611_v30 = vadd.f32 %v610_v6, %v2139_v19  ;;  %v629_v6 = vadd.f32 %v628_v16, %v2177_v47 }
 0x194   :  { %709 = vrot.lane.b32.xlu1 %v688_v10, %s1822_s20  ;;  %v619_v10 = vrot.slane %v2151_v8, 4  ;;  %v612_v12 = vrot.slane %v611_v30, 2 }
 0x195   :  { %v2227_v40 = vpop.eup %1778 }
 0x196   :  { %v2229_v42 = vpop.eup %1780  ;;  %v696_v43 = vrot.slane %v2227_v40, %v1893_v9  ;;  %v620_v11 = vadd.f32 %v619_v10, %v2151_v8  ;;  %v613_v59 = vadd.f32 %v612_v12, %v611_v30  ;;  %v655_v8 = vrot.slane %v2187_v56, 4 }
 0x197   :  { %v700_v54 = vrot.slane %v2229_v42, %v1893_v9 }
 0x198   :  { %713 = vrot.lane.b32.xlu1 %v696_v43, %s1822_s20  ;;  %v604_v43 = vadd.f32 %v603_v18, %v602_v3  ;;  %v621_v63 = vrot.slane %v620_v11, 2  ;;  %v646_v3 = vrot.slane %v2179_v48, 4  ;;  %v656_v12 = vadd.f32 %v655_v8, %v2187_v56 }
 0x199   :  { %715 = vrot.lane.b32.xlu0 %v700_v54, %s1822_s20  ;;  %v597_v54 = vadd.f32 %v596_v20, %v595_v5  ;;  %v614_v20 = vrot.slane %v613_v59, 1 }
 0x19a   :  { %v605_v50 = vrot.slane %v604_v43, 1  ;;  %v622_v10 = vadd.f32 %v621_v63, %v620_v11 }
 0x19b   :  { %v615_v30 = vadd.f32 %v614_v20, %v613_v59 }
 0x19c   :  { %v606_v19 = vadd.f32 %v605_v50, %v604_v43  ;;  %v623_v34 = vrot.slane %v622_v10, 1 }
 0x19e   :  { %v624_v11 = vadd.f32 %v623_v34, %v622_v10 }
 0x1ef   :  { %v702_v4 = vpop.permute.xlu1 %701 }
 0x1f0   :  { %v725_v52 = vadd.f32 %v702_v4, %v597_v54  ;;  %v639_v54 = vrot.slane %v638_v0, 2  ;;  %v630_v4 = vrot.slane %v629_v6, 2 }
 0x1f2   :  { %1782 = vrcp.f32 %v725_v52  ;;  %v647_v52 = vadd.f32 %v646_v3, %v2179_v48  ;;  %v640_v50 = vadd.f32 %v639_v54, %v638_v0  ;;  %v631_v16 = vadd.f32 %v630_v4, %v629_v6 }
 0x1f4   :  { %v648_v28 = vrot.slane %v647_v52, 2  ;;  %v641_v63 = vrot.slane %v640_v50, 1  ;;  %v632_v0 = vrot.slane %v631_v16, 1 }
 0x1f5   :  { %v704_v5 = vpop.permute.xlu0 %703 }
 0x1f6   :  { %v726_v18 = vadd.f32 %v704_v5, %v606_v19  ;;  %v657_v19 = vrot.slane %v656_v12, 2  ;;  %v649_v3 = vadd.f32 %v648_v28, %v647_v52  ;;  %v642_v20 = vadd.f32 %v641_v63, %v640_v50 }
 0x1f7   :  { %v633_v4 = vadd.f32 %v632_v0, %v631_v16 }
 0x1f8   :  { %1784 = vrcp.f32 %v726_v18  ;;  %v658_v6 = vadd.f32 %v657_v19, %v656_v12 }
 0x1fa   :  { %v659_v34 = vrot.slane %v658_v6, 1 }
 0x1fb   :  { %v706_v43 = vpop.permute.xlu1 %705 }
 0x1fc   :  { %v1783_v47 = vpop.eup %1782  ;;  %v727_v1 = vadd.f32 %v706_v43, %v615_v30  ;;  %v660_v19 = vadd.f32 %v659_v34, %v658_v6 }
 0x1fd   :  { %v752_v25 = vrot.slane %v1783_v47, %v1893_v9  ;;  %v811_v56 = vrot.slane %v1783_v47, %v2014_v13 }
 0x1fe   :  { %1786 = vrcp.f32 %v727_v1 }
 0x1ff   :  { %v782_v18 = vmul.f32 %v2079_v57, %v752_v25  ;;  %v781_v48 = vmul.f32 %v2074_v53, %v752_v25  ;;  %v818_v54 = vrot.slane %v811_v56, %v2014_v13  ;;  %v650_v53 = vrot.slane %v649_v3, 1 }
 0x200   :  { %v708_v5 = vpop.permute.xlu0 %707 }
 0x201   :  { %v728_v59 = vadd.f32 %v708_v5, %v624_v11  ;;  %968 = vrot.lane.b32.xlu0 %v782_v18, %s1824_s0  ;;  %966 = vrot.lane.b32.xlu1 %v781_v48, %s1824_s0  ;;  %v651_v47 = vadd.f32 %v650_v53, %v649_v3 }
 0x202   :  { %v1785_v8 = vpop.eup %1784 }
 0x203   :  { %1788 = vrcp.f32 %v728_v59  ;;  %v756_v57 = vrot.slane %v1785_v8, %v1893_v9  ;;  %v825_v12 = vrot.slane %v1785_v8, %v2014_v13 }
 0x204   :  { %v712_v10 = vpop.permute.xlu0 %711 }
 0x205   :  { %v730_v25 = vadd.f32 %v712_v10, %v642_v20  ;;  %917 = vrot.lane.b32.xlu0 %v818_v54, %s1824_s0  ;;  %v783_v28 = vmul.f32 %v2092_v27, %v756_v57  ;;  %v784_v52 = vmul.f32 %v2097_v26, %v756_v57  ;;  %v832_v16 = vrot.slane %v825_v12, %v2014_v13 }
 0x206   :  { %v710_v30 = vpop.permute.xlu1 %709 }
 0x207   :  { %v729_v43 = vadd.f32 %v710_v30, %v633_v4  ;;  %1790 = vrcp.f32 %v730_v25  ;;  %970 = vrot.lane.b32.xlu1 %v783_v28, %s1824_s0  ;;  %v1825_v4 = vmov 0.0  }
 0x208   :  { %v1787_v50 = vpop.eup %1786  ;;  %1697 = vmatprep.subr.mxu1 %v1825_v4  ;;  %1710 = vmatprep.mubr.msk.f32.mxu0 %vm1826_vm3, %v1825_v4 }
 0x209   :  { %1792 = vrcp.f32 %v729_v43  ;;  %972 = vrot.lane.b32.xlu0 %v784_v52, %s1824_s0  ;;  %v760_v27 = vrot.slane %v1787_v50, %v1893_v9  ;;  %v839_v48 = vrot.slane %v1787_v50, %v2014_v13 }
 0x20a   :  { %v714_v1 = vpop.permute.xlu1 %713 }
 0x20b   :  { %v731_v11 = vadd.f32 %v714_v1, %v651_v47  ;;  %v716_v26 = vpop.permute.xlu0 %715  ;;  %919 = vrot.lane.b32.xlu1 %v832_v16, %s1824_s0  ;;  %v786_v5 = vmul.f32 %v2118_v60, %v760_v27  ;;  %v785_v18 = vmul.f32 %v2111_v55, %v760_v27  ;;  %v846_v0 = vrot.slane %v839_v48, %v2014_v13 }
 0x20c   :  { %v732_v63 = vadd.f32 %v716_v26, %v660_v19 }
 0x20d   :  { %v1789_v56 = vpop.eup %1788  ;;  %1794 = vrcp.f32 %v731_v11  ;;  %976 = vrot.lane.b32.xlu0 %v786_v5, %s1824_s0 }
 0x20e   :  { %1796 = vrcp.f32 %v732_v63  ;;  %v764_v59 = vrot.slane %v1789_v56, %v1893_v9  ;;  %v853_v55 = vrot.slane %v1789_v56, %v2014_v13 }
 0x20f   :  { %974 = vrot.lane.b32.xlu1 %v785_v18, %s1824_s0 }
 0x210   :  { %v787_v3 = vmul.f32 %v2133_v17, %v764_v59  ;;  %v788_v6 = vmul.f32 %v2143_v21, %v764_v59  ;;  %v860_v17 = vrot.slane %v853_v55, %v2014_v13 }
 0x211   :  { %v1791_v60 = vpop.eup %1790  ;;  %921 = vrot.lane.b32.xlu0 %v846_v0, %s1824_s0 }
 0x212   :  { %v772_v8 = vrot.slane %v1791_v60, %v1893_v9  ;;  %v881_v43 = vrot.slane %v1791_v60, %v2014_v13 }
 0x213   :  { %v1793_v20 = vpop.eup %1792  ;;  %978 = vrot.lane.b32.xlu1 %v787_v3, %s1824_s0 }
 0x214   :  { %v768_v10 = vrot.slane %v1793_v20, %v1893_v9  ;;  %v791_v54 = vmul.f32 %v2145_v22, %v772_v8  ;;  %v792_v57 = vmul.f32 %v2149_v24, %v772_v8  ;;  %v867_v28 = vrot.slane %v1793_v20, %v2014_v13 }
 0x215   :  { %980 = vrot.lane.b32.xlu0 %v788_v6, %s1824_s0 }
 0x216   :  { %v790_v21 = vmul.f32 %v2169_v41, %v768_v10  ;;  %v789_v25 = vmul.f32 %v2157_v33, %v768_v10  ;;  %v874_v34 = vrot.slane %v867_v28, %v2014_v13 }
 0x217   :  { %v1795_v53 = vpop.eup %1794  ;;  %923 = vrot.lane.b32.xlu1 %v860_v17, %s1824_s0 }
 0x218   :  { %v1797_v30 = vpop.eup %1796  ;;  %v776_v22 = vrot.slane %v1795_v53, %v1893_v9 }
 0x219   :  { %v780_v24 = vrot.slane %v1797_v30, %v1893_v9  ;;  %984 = vrot.lane.b32.xlu0 %v790_v21, %s1824_s0  ;;  %v895_v9 = vrot.slane %v1795_v53, %v2014_v13 }
 0x21a   :  { %v793_v52 = vmul.f32 %v2161_v35, %v776_v22  ;;  %v794_v12 = vmul.f32 %v2165_v39, %v776_v22  ;;  %v888_v35 = vrot.slane %v881_v43, %v2014_v13  ;;  %v1430_v43 = vld [vmem:[%s2435_s6 + $0x8] sm:$0xff] }
 0x21b   :  { %v796_v41 = vmul.f32 %v2181_v51, %v780_v24  ;;  %v795_v33 = vmul.f32 %v2175_v44, %v780_v24  ;;  %982 = vrot.lane.b32.xlu1 %v789_v25, %s1824_s0  ;;  %v902_v39 = vrot.slane %v895_v9, %v2014_v13  ;;  %v909_v44 = vrot.slane %v1797_v30, %v2014_v13 }
 0x21c   :  { %v1827_v9 = vmov 0.0|0.0  }
 0x21d   :  { %925 = vrot.lane.b32.xlu0 %v874_v34, %s1824_s0  ;;  %v916_v51 = vrot.slane %v909_v44, %v2014_v13  ;;  %v1429_v34 = vld [vmem:[%s2435_s6] sm:$0xff]  ;;  %1721 = vmatprep.subr.bf16.mxu0 %v1827_v9 }
 0x21f   :  { %986 = vrot.lane.b32.xlu1 %v791_v54, %s1824_s0 }
 0x221   :  { %988 = vrot.lane.b32.xlu0 %v792_v57, %s1824_s0 }
 0x223   :  { %927 = vrot.lane.b32.xlu1 %v888_v35, %s1824_s0  ;;  %v1722_v35 = vpack.c.bf16 %v1430_v43, %v1429_v34 }
 0x225   :  { %929 = vrot.lane.b32.xlu0 %v902_v39, %s1824_s0  ;;  %1723 = vmatpush3.bf16.msra.mxu0 %v1722_v35  ;;  %v2453_v35 = vld [vmem:[#allocation8_spill] sm:$0xff] }
 0x226   :  { %1724 = vmatprep.subr.bf16.mxu0 %v1827_v9 }
 0x227   :  { %990 = vrot.lane.b32.xlu1 %v793_v52, %s1824_s0 }
 0x229   :  { %992 = vrot.lane.b32.xlu0 %v794_v12, %s1824_s0 }
 0x22b   :  { %931 = vrot.lane.b32.xlu1 %v916_v51, %s1824_s0 }
 0x22d   :  { %996 = vrot.lane.b32.xlu0 %v796_v41, %s1824_s0 }
 0x22f   :  { %994 = vrot.lane.b32.xlu1 %v795_v33, %s1824_s0 }
 0x273   :  { %v969_v50 = vpop.permute.xlu0 %968  ;;  %v967_v47 = vpop.permute.xlu1 %966 }
 0x274   :  { %1673 = vmatprep.mubr.msk.f32.mxu1 %vm998_vm4, %v967_v47 }
 0x275   :  { %1674 = vmatmul.mubr.msk.f32.vlgmr.msra.gmra.mrb[0].mxu1 %vm998_vm4, %v969_v50 }
 0x276   :  { %1698 = vmatpush3.msk.msra.mxu1 %vm1031_vm2, %v2240_v46 }
 0x277   :  { %v918_v1 = vpop.permute.xlu0 %917 }
 0x278   :  { %v941_v54 = vmul.f32 %v2192_v15, %v918_v1 }
 0x279   :  { %v971_v16 = vpop.permute.xlu1 %970 }
 0x27a   :  { %1676 = vmatprep.mubr.msk.f32.mxu1 %vm998_vm4, %v971_v16 }
 0x27b   :  { %v973_v19 = vpop.permute.xlu0 %972 }
 0x27c   :  { %1677 = vmatmul.mubr.msk.f32.gmra.mrb[2].mxu1 %vm998_vm4, %v973_v19 }
 0x27d   :  { %v920_v27 = vpop.permute.xlu1 %919 }
 0x27e   :  { %v942_v8 = vmul.f32 %v2198_v37, %v920_v27 }
 0x27f   :  { %v977_v11 = vpop.permute.xlu0 %976 }
 0x280   :  { %v1276_v25 = vcombine.low %v941_v54, %v942_v8 }
 0x281   :  { %v975_v26 = vpop.permute.xlu1 %974 }
 0x282   :  { %1679 = vmatprep.mubr.msk.f32.mxu1 %vm998_vm4, %v975_v26  ;;  %v1286_v15 = vrot.slane %v1276_v25, %v2014_v13  ;;  %v2450_v25 = vld [vmem:[#allocation5_spill] sm:$0xff] }
 0x283   :  { %1680 = vmatmul.mubr.msk.f32.gmra.mrb[4].mxu1 %vm998_vm4, %v977_v11  ;;  %v922_v63 = vpop.permute.xlu0 %921 }
 0x284   :  { %v943_v20 = vmul.f32 %v2205_v62, %v922_v63 }
 0x285   :  { %v979_v5 = vpop.permute.xlu1 %978 }
 0x286   :  { %1682 = vmatprep.mubr.msk.f32.mxu1 %vm998_vm4, %v979_v5 }
 0x287   :  { %v981_v18 = vpop.permute.xlu0 %980 }
 0x288   :  { %1683 = vmatmul.mubr.msk.f32.gmra.mrb[6].mxu1 %vm998_vm4, %v981_v18 }
 0x289   :  { %v924_v46 = vpop.permute.xlu1 %923 }
 0x28a   :  { %v944_v60 = vmul.f32 %v2212_v2, %v924_v46 }
 0x28b   :  { %v985_v48 = vpop.permute.xlu0 %984 }
 0x28c   :  { %v1277_v57 = vcombine.low %v943_v20, %v944_v60 }
 0x28d   :  { %v983_v56 = vpop.permute.xlu1 %982 }
 0x28e   :  { %1685 = vmatprep.mubr.msk.f32.mxu1 %vm998_vm4, %v983_v56  ;;  %v1293_v30 = vrot.slane %v1277_v57, %v2014_v13 }
 0x28f   :  { %1686 = vmatmul.mubr.msk.f32.gmra.mrb[8].mxu1 %vm998_vm4, %v985_v48  ;;  %v926_v59 = vpop.permute.xlu0 %925 }
 0x290   :  { %v945_v53 = vmul.f32 %v2221_v32, %v926_v59  ;;  %v1308_v52 = vcombine.low %v1286_v15, %v1293_v30 }
 0x291   :  { %v987_v0 = vpop.permute.xlu1 %986 }
 0x292   :  { %1688 = vmatprep.mubr.msk.f32.mxu1 %vm998_vm4, %v987_v0 }
 0x293   :  { %v989_v3 = vpop.permute.xlu0 %988 }
 0x294   :  { %1689 = vmatmul.mubr.msk.f32.gmra.mrb[10].mxu1 %vm998_vm4, %v989_v3 }
 0x295   :  { %v928_v6 = vpop.permute.xlu1 %927 }
 0x296   :  { %v946_v17 = vmul.f32 %v2217_v23, %v928_v6 }
 0x297   :  { %v930_v55 = vpop.permute.xlu0 %929 }
 0x298   :  { %v1278_v37 = vcombine.low %v945_v53, %v946_v17  ;;  %v947_v62 = vmul.f32 %v2227_v40, %v930_v55  ;;  %v1316_v40 = vrot.slane %v1308_v52, %v2014_v13 }
 0x299   :  { %v991_v10 = vpop.permute.xlu1 %990 }
 0x29a   :  { %1691 = vmatprep.mubr.msk.f32.mxu1 %vm998_vm4, %v991_v10  ;;  %v1300_v12 = vrot.slane %v1278_v37, %v2014_v13 }
 0x29b   :  { %v993_v21 = vpop.permute.xlu0 %992 }
 0x29c   :  { %1692 = vmatmul.mubr.msk.f32.gmra.mrb[12].mxu1 %vm998_vm4, %v993_v21 }
 0x29d   :  { %v932_v2 = vpop.permute.xlu1 %931 }
 0x29e   :  { %v948_v28 = vmul.f32 %v2229_v42, %v932_v2  ;;  %v2451_v2 = vld [vmem:[#allocation6_spill] sm:$0xff] }
 0x29f   :  { %v997_v23 = vpop.permute.xlu0 %996 }
 0x2a0   :  { %v1279_v22 = vcombine.low %v947_v62, %v948_v28 }
 0x2a1   :  { %v995_v24 = vpop.permute.xlu1 %994 }
 0x2a2   :  { %v1307_v32 = vrot.slane %v1279_v22, %v2014_v13  ;;  %1694 = vmatprep.mubr.msk.f32.mxu1 %vm998_vm4, %v995_v24 }
 0x2a3   :  { %1695 = vmatmul.mubr.msk.f32.gmra.mrb[14].mxu1 %vm998_vm4, %v997_v23 }
 0x2a4   :  { %v1309_v41 = vcombine.low %v1300_v12, %v1307_v32  ;;  %1699 = vmatprep.mubr.msk.f32.mxu1 %vm1826_vm3, %v1825_v4  ;;  %v1432_v4 = vld [vmem:[%s2435_s6 + $0x18] sm:$0xff] }
 0x2a6   :  { %v1323_v42 = vrot.slane %v1309_v41, %v2014_v13  ;;  %v1431_v13 = vld [vmem:[%s2435_s6 + $0x10] sm:$0xff] }
 0x2a7   :  { %v1725_v39 = vpack.c.bf16 %v1432_v4, %v1431_v13 }
 0x2a8   :  { %v1324_v33 = vcombine.low %v1316_v40, %v1323_v42 }
 0x2a9   :  { %1726 = vmatpush3.bf16.msra.mxu0 %v1725_v39 }
 0x2aa   :  { %1700 = vmatmul.mubr.msk.f32.vlgmr.msra.gmra.mrb[16].mxu1 %vm998_vm4, %v1324_v33  ;;  %v2452_v33 = vld [vmem:[#allocation7_spill] sm:$0xff] }
 0x348   :  { %v1675_v44 = vpop.f32.mrb[0].mxu1 }
 0x349   :  { %v1181_v51 = vmul.f32 %v1675_v44, %v1969_v29  ;;  %v1101_v50 = vpop.f32.mrb[1].mxu1 }
 0x34a   :  { %v1180_v47 = vmul.f32 %v1101_v50, %v1972_v31 }
 0x34b   :  { %v1197_v1 = vsel %vm57_vm0, %v1181_v51, 0.0 }
 0x34c   :  { %v1196_v16 = vsel %vm57_vm0, %v1180_v47, 0.0 }
 0x34d   :  { %v1198_v19 = vadd.f32 %v1197_v1, %v1196_v16 }
 0x34f   :  { %v1678_v27 = vpop.f32.mrb[2].mxu1  ;;  %v1199_v37 = vrot.slane %v1198_v19, 4 }
 0x350   :  { %v1183_v11 = vmul.f32 %v1678_v27, %v1979_v36  ;;  %v1111_v26 = vpop.f32.mrb[3].mxu1 }
 0x351   :  { %v1182_v63 = vmul.f32 %v1111_v26, %v1982_v38  ;;  %v1200_v24 = vadd.f32 %v1199_v37, %v1198_v19 }
 0x352   :  { %v1206_v5 = vsel %vm57_vm0, %v1183_v11, 0.0 }
 0x353   :  { %v1205_v18 = vsel %vm57_vm0, %v1182_v63, 0.0  ;;  %v1201_v4 = vrot.slane %v1200_v24, 2 }
 0x354   :  { %v1207_v46 = vadd.f32 %v1206_v5, %v1205_v18 }
 0x355   :  { %v1202_v27 = vadd.f32 %v1201_v4, %v1200_v24 }
 0x356   :  { %v1681_v29 = vpop.f32.mrb[4].mxu1  ;;  %v1208_v62 = vrot.slane %v1207_v46, 4 }
 0x357   :  { %v1185_v48 = vmul.f32 %v1681_v29, %v1989_v45  ;;  %v1121_v31 = vpop.f32.mrb[5].mxu1  ;;  %v2454_v29 = vld [vmem:[#allocation9_spill] sm:$0xff] }
 0x358   :  { %v1184_v56 = vmul.f32 %v1121_v31, %v1992_v49  ;;  %v1209_v52 = vadd.f32 %v1208_v62, %v1207_v46 }
 0x359   :  { %v1215_v59 = vsel %vm57_vm0, %v1185_v48, 0.0 }
 0x35a   :  { %v1214_v0 = vsel %vm57_vm0, %v1184_v56, 0.0  ;;  %v1210_v39 = vrot.slane %v1209_v52, 2 }
 0x35b   :  { %v1216_v3 = vadd.f32 %v1215_v59, %v1214_v0  ;;  %v1684_v36 = vpop.f32.mrb[6].mxu1  ;;  %v2455_v59 = vld [vmem:[#allocation10_spill] sm:$0xff] }
 0x35c   :  { %v1187_v6 = vmul.f32 %v1684_v36, %v1999_v58  ;;  %v1131_v38 = vpop.f32.mrb[7].mxu1  ;;  %v1211_v11 = vadd.f32 %v1210_v39, %v1209_v52 }
 0x35d   :  { %v1186_v60 = vmul.f32 %v1131_v38, %v2002_v61  ;;  %v1217_v15 = vrot.slane %v1216_v3, 4 }
 0x35e   :  { %v1224_v55 = vsel %vm57_vm0, %v1187_v6, 0.0  ;;  %v1203_v6 = vrot.slane %v1202_v27, 1  ;;  %v1212_v38 = vrot.slane %v1211_v11, 1 }
 0x35f   :  { %v1223_v8 = vsel %vm57_vm0, %v1186_v60, 0.0  ;;  %v1218_v32 = vadd.f32 %v1217_v15, %v1216_v3 }
 0x360   :  { %v1225_v20 = vadd.f32 %v1224_v55, %v1223_v8 }
 0x361   :  { %v1219_v51 = vrot.slane %v1218_v32, 2 }
 0x362   :  { %v1687_v45 = vpop.f32.mrb[8].mxu1 }
 0x363   :  { %v1189_v10 = vmul.f32 %v1687_v45, %v2011_v7  ;;  %v1141_v49 = vpop.f32.mrb[9].mxu1  ;;  %v1226_v7 = vrot.slane %v1225_v20, 4  ;;  %v1220_v5 = vadd.f32 %v1219_v51, %v1218_v32 }
 0x364   :  { %v1188_v54 = vmul.f32 %v1141_v49, %v2017_v14  ;;  %v1592_v49 = vld [vmem:[%s2433_s4] ss:$0 sm:$0xff] }
 0x365   :  { %v1233_v57 = vsel %vm57_vm0, %v1189_v10, 0.0  ;;  %v1227_v41 = vadd.f32 %v1226_v7, %v1225_v20  ;;  %v1221_v8 = vrot.slane %v1220_v5, 1 }
 0x366   :  { %v1232_v17 = vsel %vm57_vm0, %v1188_v54, 0.0 }
 0x367   :  { %v1234_v21 = vadd.f32 %v1233_v57, %v1232_v17  ;;  %v1690_v58 = vpop.f32.mrb[10].mxu1  ;;  %v1228_v50 = vrot.slane %v1227_v41, 2 }
 0x368   :  { %v1191_v53 = vmul.f32 %v1690_v58, %v2450_v25  ;;  %v1151_v61 = vpop.f32.mrb[11].mxu1  ;;  %v1204_v58 = vadd.f32 %v1203_v6, %v1202_v27  ;;  %v1213_v25 = vadd.f32 %v1212_v38, %v1211_v11 }
 0x369   :  { %v1190_v30 = vmul.f32 %v1151_v61, %v2451_v2  ;;  %v1235_v22 = vrot.slane %v1234_v21, 4  ;;  %v1229_v18 = vadd.f32 %v1228_v50, %v1227_v41 }
 0x36a   :  { %v1242_v28 = vsel %vm57_vm0, %v1191_v53, 0.0 }
 0x36b   :  { %v1241_v14 = vsel %vm57_vm0, %v1190_v30, 0.0  ;;  %v1236_v40 = vadd.f32 %v1235_v22, %v1234_v21  ;;  %v1230_v20 = vrot.slane %v1229_v18, 1  ;;  %v1222_v30 = vadd.f32 %v1221_v8, %v1220_v5 }
 0x36c   :  { %v1243_v23 = vadd.f32 %v1242_v28, %v1241_v14 }
 0x36d   :  { %v1237_v47 = vrot.slane %v1236_v40, 2  ;;  %v1231_v37 = vadd.f32 %v1230_v20, %v1229_v18 }
 0x36e   :  { %v1244_v12 = vrot.slane %v1243_v23, 4 }
 0x36f   :  { %v1693_v42 = vpop.f32.mrb[12].mxu1  ;;  %v1238_v46 = vadd.f32 %v1237_v47, %v1236_v40 }
 0x370   :  { %v1193_v34 = vmul.f32 %v1693_v42, %v2452_v33  ;;  %v1161_v43 = vpop.f32.mrb[13].mxu1  ;;  %v1245_v9 = vadd.f32 %v1244_v12, %v1243_v23 }
 0x371   :  { %v1192_v13 = vmul.f32 %v1161_v43, %v2453_v35  ;;  %v1239_v45 = vrot.slane %v1238_v46, 1 }
 0x372   :  { %v1251_v44 = vsel %vm57_vm0, %v1193_v34, 0.0  ;;  %v1246_v19 = vrot.slane %v1245_v9, 2 }
 0x373   :  { %v1250_v1 = vsel %vm57_vm0, %v1192_v13, 0.0  ;;  %v1240_v62 = vadd.f32 %v1239_v45, %v1238_v46 }
 0x374   :  { %v1252_v16 = vadd.f32 %v1251_v44, %v1250_v1  ;;  %v1247_v3 = vadd.f32 %v1246_v19, %v1245_v9 }
 0x376   :  { %v1253_v26 = vrot.slane %v1252_v16, 4  ;;  %v1696_v63 = vpop.f32.mrb[14].mxu1  ;;  %v1248_v57 = vrot.slane %v1247_v3, 1 }
 0x377   :  { %v1195_v48 = vmul.f32 %v1696_v63, %v2454_v29  ;;  %v1171_v31 = vpop.f32.mrb[15].mxu1 }
 0x378   :  { %v1254_v56 = vadd.f32 %v1253_v26, %v1252_v16  ;;  %v1194_v0 = vmul.f32 %v1171_v31, %v2455_v59  ;;  %v1249_v23 = vadd.f32 %v1248_v57, %v1247_v3 }
 0x379   :  { %v1260_v36 = vsel %vm57_vm0, %v1195_v48, 0.0  ;;  %v1593_v48 = vld [vmem:[%s2436_s7] ss:$0 sm:$0xff] }
 0x37a   :  { %v1255_v60 = vrot.slane %v1254_v56, 2  ;;  %v1259_v55 = vsel %vm57_vm0, %v1194_v0, 0.0 }
 0x37b   :  { %v1261_v10 = vadd.f32 %v1260_v36, %v1259_v55 }
 0x37c   :  { %v1256_v54 = vadd.f32 %v1255_v60, %v1254_v56 }
 0x37d   :  { %v1262_v17 = vrot.slane %v1261_v10, 4  ;;  %v1393_v21 = vpop.f32.mrb[16].mxu1 }
 0x37e   :  { %v1257_v53 = vrot.slane %v1256_v54, 1  ;;  %v1404_v61 = vmul.f32 %v1592_v49, %v1393_v21  ;;  %v1701_v2 = vpop.f32.mrb[17].mxu1 }
 0x37f   :  { %v1263_v28 = vadd.f32 %v1262_v17, %v1261_v10 }
 0x380   :  { %v1258_v15 = vadd.f32 %v1257_v53, %v1256_v54  ;;  %v1406_v7 = vrot.slane %v1404_v61, 1  ;;  %v1407_v22 = vrot.slane %v1404_v61, 2  ;;  %v1408_v14 = vrot.slane %v1404_v61, 3 }
 0x381   :  { %v1264_v24 = vrot.slane %v1263_v28, 2  ;;  %v1409_v52 = vrot.slane %v1404_v61, 4  ;;  %v1410_v12 = vrot.slane %v1404_v61, 5  ;;  %v1411_v32 = vrot.slane %v1404_v61, 6 }
 0x382   :  { %v1421_v41 = vadd.f32 %v1404_v61, %v1204_v58  ;;  %v1422_v40 = vadd.f32 %v1406_v7, %v1213_v25  ;;  %v1423_v42 = vadd.f32 %v1407_v22, %v1222_v30  ;;  %v1424_v34 = vadd.f32 %v1408_v14, %v1231_v37 }
 0x383   :  { %v1265_v33 = vadd.f32 %v1264_v24, %v1263_v28  ;;  %v1425_v43 = vadd.f32 %v1409_v52, %v1240_v62  ;;  %v1426_v9 = vadd.f32 %v1410_v12, %v1249_v23  ;;  %v1427_v35 = vadd.f32 %v1411_v32, %v1258_v15 }
 0x384   :  { %v1448_v13 = vrot.slane %v1422_v40, 7  ;;  %v1451_v4 = vrot.slane %v1423_v42, 6  ;;  %v1454_v51 = vrot.slane %v1424_v34, 5  ;;  %v1412_v47 = vrot.slane %v1404_v61, 7 }
 0x385   :  { %v1266_v39 = vrot.slane %v1265_v33, 1  ;;  %v1457_v16 = vrot.slane %v1425_v43, 4  ;;  %v1460_v27 = vrot.slane %v1426_v9, 3  ;;  %v1463_v63 = vrot.slane %v1427_v35, 2 }
 0x386   :  { %v1450_v44 = vsel %vm1449_vm5, %v1448_v13, %v1421_v41 }
 0x387   :  { %v1267_v50 = vadd.f32 %v1266_v39, %v1265_v33  ;;  %v1453_v1 = vsel %vm1452_vm6, %v1451_v4, %v1450_v44 }
 0x388   :  { %v1456_v19 = vsel %vm1455_vm7, %v1454_v51, %v1453_v1 }
 0x389   :  { %v1428_v11 = vadd.f32 %v1412_v47, %v1267_v50  ;;  %v1459_v26 = vsel %vm1458_vm8, %v1457_v16, %v1456_v19 }
 0x38a   :  { %v1462_v5 = vsel %vm1461_vm9, %v1460_v27, %v1459_v26 }
 0x38b   :  { %v1465_v18 = vsel %vm1464_vm10, %v1463_v63, %v1462_v5  ;;  %v1466_v46 = vrot.slane %v1428_v11, 1 }
 0x38d   :  { %v1468_v29 = vsel %vm1467_vm11, %v1466_v46, %v1465_v18 }
 0x38e   :  { %1711 = vmatmul.mubr.msk.f32.vlgmr.msra.gmra.mrb[16].mxu0 %vm57_vm0, %v1468_v29 }
 0x461   :  { %v1537_v31 = vpop.f32.mrb[16].mxu0 }
 0x462   :  { %v1538_v56 = vadd.f32 %v1593_v48, %v1537_v31  ;;  %v1712_v59 = vpop.f32.mrb[17].mxu0 }
 0x464   :  { %1541 = vst.msk [vmem:[#allocation2] sm:$0xff] %vm57_vm0, %v1538_v56 }
 0x465   :  { %1809 = shalt.err (!%p1806_p4)
}
 0x466   :  { %s1810_s1 = scalar_lea.hbm %s2437_s8, 128 }
 0x467   :  { %p1811_p5 = scmp.ne.s32.totalorder %s2437_s8, %s1810_s1  ;;  %p1814_p6 = scmp.lt.u32.totalorder %s1810_s1, %s2437_s8 }
 0x469   :  { %p1816_p7 = pnand %p1814_p6, %p1811_p5 }
 0x46b   :  { %1819 = shalt.err (!%p1816_p7)
}
 0x46c   :  { %1551 = dma.vmem_to_hbm [thread:$0]  %s1549_s13, 128, %s2437_s8, [#allocation3]  }
 0x46d   :  { %1820 = dma.done.wait [#allocation3], 128  }
 0x46e   :  { %1821 = vsyncadd [#allocation3], 4294967168 }
 0x46f   :  { %1555 = vsyncpa [#allocation3], 1 }

</bundles_post_ra>
